<compile_context>
chip_gen: v7x
topology: tpu7x:2x2x1
jax: 0.10.0
libtpu: 0.0.40
codegen_flags: <defaults>
</compile_context>

<pallas_src>
import jax
import jax.numpy as jnp
from jax.experimental import pallas as pl
from jax.experimental.pallas import tpu as pltpu


def _pinn_fwd_kernel(x_ref, w1_ref, b1_ref, w2_ref, b2_ref, o_ref):
    # One batch tile: (TB, static_dim) -> (TB, 2), all math in f32.
    x = x_ref[...].astype(jnp.float32)
    h = jnp.dot(x, w1_ref[...], preferred_element_type=jnp.float32) + b1_ref[...]
    h = jnp.maximum(h, 0.0)
    y = jnp.dot(h, w2_ref[...], preferred_element_type=jnp.float32) + b2_ref[...]
    y = jnp.maximum(y, 0.0) + 0.01
    o_ref[...] = y.astype(o_ref.dtype)


def simple_pinn_forward(static_features, w1, b1, w2, b2, *, block_rows=None):
    """Forward pass of SimplePINNModule as a single fused Pallas kernel.

    static_features: (B, static_dim)
    w1: (static_dim, 8), b1: (8,)   -- main_layer (already in x@W layout)
    w2: (8, 2),          b2: (2,)   -- output_layer
    returns: (B, 2) delta_w
    """
    B, D = static_features.shape
    H = w1.shape[1]
    O = w2.shape[1]

    # Batch tile targeting ~4 MiB of input per block (f32): big enough to
    # amortize per-step overhead, small enough that double-buffered in+out
    # fits every generation's default scoped VMEM (incl. v5e's 16 MiB).
    if block_rows is None:
        target_bytes = 4 * 1024 * 1024
        block_rows = max(8, ((target_bytes // (D * 4)) // 8) * 8)
    tb = min(block_rows, B)
    if tb < B:
        tb = max(8, (tb // 8) * 8)  # sublane-aligned when actually tiling
    grid = (pl.cdiv(B, tb),)

    w1_f = w1.astype(jnp.float32)
    w2_f = w2.astype(jnp.float32)
    b1_2d = b1.reshape(1, H).astype(jnp.float32)
    b2_2d = b2.reshape(1, O).astype(jnp.float32)

    itemsize = jnp.dtype(static_features.dtype).itemsize
    cost = pl.CostEstimate(
        flops=2 * B * D * H + 2 * B * H * O,
        transcendentals=0,
        bytes_accessed=(B * D * itemsize + B * O * itemsize
                        + (D * H + H + H * O + O) * 4),
    )

    return pl.pallas_call(
        _pinn_fwd_kernel,
        out_shape=jax.ShapeDtypeStruct((B, O), static_features.dtype),
        grid_spec=pltpu.PrefetchScalarGridSpec(
            num_scalar_prefetch=0,
            grid=grid,
            in_specs=[
                pl.BlockSpec((tb, D), lambda i: (i, 0)),   # batch tile of x
                pl.BlockSpec((D, H), lambda i: (0, 0)),    # W1 (resident, tiny)
                pl.BlockSpec((1, H), lambda i: (0, 0)),    # b1
                pl.BlockSpec((H, O), lambda i: (0, 0)),    # W2
                pl.BlockSpec((1, O), lambda i: (0, 0)),    # b2
            ],
            out_specs=pl.BlockSpec((tb, O), lambda i: (i, 0)),
        ),
        compiler_params=pltpu.CompilerParams(
            dimension_semantics=("parallel",)),
        cost_estimate=cost,
    )(static_features, w1_f, b1_2d, w2_f, b2_2d)


def _reference(x, w1, b1, w2, b2):
    h = jnp.maximum(x @ w1 + b1, 0.0)
    return jnp.maximum(h @ w2 + b2, 0.0) + 0.01


# TODO(synk): compute_physical_loss is a training-time auxiliary loss, not part
# of forward(); it is not implemented as a kernel here.

if __name__ == "__main__":
    key = jax.random.PRNGKey(0)
    k1, k2, kx = jax.random.split(key, 3)

    static_dim = 32
    B = 2

    # Kaiming-normal style init (relu gain), constant 0.01 biases — matches
    # the PyTorch module's init scheme (values differ, semantics identical).
    w1 = jax.random.normal(k1, (static_dim, 8), jnp.float32) * jnp.sqrt(2.0 / static_dim)
    b1 = jnp.full((8,), 0.01, jnp.float32)
    w2 = jax.random.normal(k2, (8, 2), jnp.float32) * jnp.sqrt(2.0 / 8)
    b2 = jnp.full((2,), 0.01, jnp.float32)

    x = jax.random.normal(kx, (B, static_dim), dtype=jnp.float32)

    out = simple_pinn_forward(x, w1, b1, w2, b2)
    out = jax.block_until_ready(out)

    ref = _reference(x, w1, b1, w2, b2)
    assert out.shape == (B, 2)
    assert out.dtype == x.dtype
    assert jnp.allclose(out, ref, atol=1e-5, rtol=1e-5), "mismatch vs reference (small)"

    # Exercise the multi-block batch-tiled path as well.
    xb = jax.random.normal(kx, (4096, static_dim), dtype=jnp.float32)
    outb = jax.block_until_ready(
        simple_pinn_forward(xb, w1, b1, w2, b2, block_rows=1024))
    refb = _reference(xb, w1, b1, w2, b2)
    assert jnp.allclose(outb, refb, atol=1e-5, rtol=1e-5), "mismatch vs reference (tiled)"

    print("KERNEL_OK")
</pallas_src>

<mosaic_0001>
module attributes {stable_mosaic.version = 11 : i64} {
  func.func @_pinn_fwd_kernel(%arg0: i32, %arg1: memref<2x32xf32, #tpu.memory_space<vmem>>, %arg2: memref<32x8xf32, #tpu.memory_space<vmem>>, %arg3: memref<1x8xf32, #tpu.memory_space<vmem>>, %arg4: memref<8x2xf32, #tpu.memory_space<vmem>>, %arg5: memref<1x2xf32, #tpu.memory_space<vmem>>, %arg6: memref<2x2xf32, #tpu.memory_space<vmem>>) attributes {dimension_semantics = [#tpu.dimension_semantics<parallel>], iteration_bounds = array<i64: 1>, scalar_prefetch = 0 : i64, scratch_operands = 0 : i64, tpu.core_type = #tpu.core_type<tc>, window_params = [{transform_indices = @transform_0, window_bounds = array<i64: 2, 32>}, {pipeline_mode = #tpu.pipeline_mode<synchronous>, transform_indices = @transform_1, window_bounds = array<i64: 32, 8>}, {pipeline_mode = #tpu.pipeline_mode<synchronous>, transform_indices = @transform_2, window_bounds = array<i64: 1, 8>}, {pipeline_mode = #tpu.pipeline_mode<synchronous>, transform_indices = @transform_3, window_bounds = array<i64: 8, 2>}, {pipeline_mode = #tpu.pipeline_mode<synchronous>, transform_indices = @transform_4, window_bounds = array<i64: 1, 2>}, {transform_indices = @transform_5, window_bounds = array<i64: 2, 2>}]} {
    %c0 = arith.constant 0 : index
    %c0_0 = arith.constant 0 : index
    %0 = vector.load %arg1[%c0, %c0_0] : memref<2x32xf32, #tpu.memory_space<vmem>>, vector<2x32xf32>
    %c0_1 = arith.constant 0 : index
    %c0_2 = arith.constant 0 : index
    %1 = vector.load %arg2[%c0_1, %c0_2] : memref<32x8xf32, #tpu.memory_space<vmem>>, vector<32x8xf32>
    %cst = arith.constant dense<0.000000e+00> : vector<2x8xf32>
    %2 = tpu.matmul %0, %1, %cst {dimension_numbers = #tpu.dot_dimension_numbers<[1], [0], [0], [1], [0, 0, 1, 1], [], []>} : vector<2x32xf32>, vector<32x8xf32>, vector<2x8xf32> -> vector<2x8xf32>
    %c0_3 = arith.constant 0 : index
    %c0_4 = arith.constant 0 : index
    %3 = vector.load %arg3[%c0_3, %c0_4] : memref<1x8xf32, #tpu.memory_space<vmem>>, vector<1x8xf32>
    %4 = vector.broadcast %3 : vector<1x8xf32> to vector<2x8xf32>
    %5 = arith.addf %2, %4 : vector<2x8xf32>
    %cst_5 = arith.constant 0.000000e+00 : f32
    %6 = vector.broadcast %cst_5 : f32 to vector<2x8xf32>
    %7 = arith.maximumf %5, %6 : vector<2x8xf32>
    %c0_6 = arith.constant 0 : index
    %c0_7 = arith.constant 0 : index
    %8 = vector.load %arg4[%c0_6, %c0_7] : memref<8x2xf32, #tpu.memory_space<vmem>>, vector<8x2xf32>
    %cst_8 = arith.constant dense<0.000000e+00> : vector<2x2xf32>
    %9 = tpu.matmul %7, %8, %cst_8 {dimension_numbers = #tpu.dot_dimension_numbers<[1], [0], [0], [1], [0, 0, 1, 1], [], []>} : vector<2x8xf32>, vector<8x2xf32>, vector<2x2xf32> -> vector<2x2xf32>
    %c0_9 = arith.constant 0 : index
    %c0_10 = arith.constant 0 : index
    %10 = vector.load %arg5[%c0_9, %c0_10] : memref<1x2xf32, #tpu.memory_space<vmem>>, vector<1x2xf32>
    %11 = vector.broadcast %10 : vector<1x2xf32> to vector<2x2xf32>
    %12 = arith.addf %9, %11 : vector<2x2xf32>
    %cst_11 = arith.constant 0.000000e+00 : f32
    %13 = vector.broadcast %cst_11 : f32 to vector<2x2xf32>
    %14 = arith.maximumf %12, %13 : vector<2x2xf32>
    %cst_12 = arith.constant 0.00999999977 : f32
    %15 = vector.broadcast %cst_12 : f32 to vector<2x2xf32>
    %16 = arith.addf %14, %15 : vector<2x2xf32>
    %c0_13 = arith.constant 0 : index
    %c0_14 = arith.constant 0 : index
    %17 = vector.load %arg6[%c0_13, %c0_14] : memref<2x2xf32, #tpu.memory_space<vmem>>, vector<2x2xf32>
    tpu.vector_store %arg6[%c0_13, %c0_14], %16 {strides = array<i32>} : memref<2x2xf32, #tpu.memory_space<vmem>>, vector<2x2xf32>,
    return
  }
  func.func @transform_0(%arg0: i32) -> (i32, i32) {
    %c0_i32 = arith.constant 0 : i32
    %c0_i32_0 = arith.constant 0 : i32
    return %arg0, %c0_i32 : i32, i32
  }
  func.func @transform_1(%arg0: i32) -> (i32, i32) {
    %c0_i32 = arith.constant 0 : i32
    %c0_i32_0 = arith.constant 0 : i32
    %c0_i32_1 = arith.constant 0 : i32
    return %c0_i32, %c0_i32_0 : i32, i32
  }
  func.func @transform_2(%arg0: i32) -> (i32, i32) {
    %c0_i32 = arith.constant 0 : i32
    %c0_i32_0 = arith.constant 0 : i32
    %c0_i32_1 = arith.constant 0 : i32
    return %c0_i32, %c0_i32_0 : i32, i32
  }
  func.func @transform_3(%arg0: i32) -> (i32, i32) {
    %c0_i32 = arith.constant 0 : i32
    %c0_i32_0 = arith.constant 0 : i32
    %c0_i32_1 = arith.constant 0 : i32
    return %c0_i32, %c0_i32_0 : i32, i32
  }
  func.func @transform_4(%arg0: i32) -> (i32, i32) {
    %c0_i32 = arith.constant 0 : i32
    %c0_i32_0 = arith.constant 0 : i32
    %c0_i32_1 = arith.constant 0 : i32
    return %c0_i32, %c0_i32_0 : i32, i32
  }
  func.func @transform_5(%arg0: i32) -> (i32, i32) {
    %c0_i32 = arith.constant 0 : i32
    %c0_i32_0 = arith.constant 0 : i32
    return %arg0, %c0_i32 : i32, i32
  }
}

</mosaic_0001>

<bundles_post_ra>
// kernel: tpu_custom_call.1
= control target key start
LH: loop header
LB: loop body
LE: loop exit
PB: predicated region body
PF: predicated region fallthrough
CT: control target
= control target key end

     0   :  { %v269_v3 = vmov 0.0|0.0   ;;  %vm270_vm0 = vmmov 0   ;;  %v271_v6 = vmov 0.0   ;;  %s339_s0 = inlined_call_operand.vmem [shape: f32[2,32], index: 0, kind: input, shape index: {}]   ;;  %s340_s1 = inlined_call_operand.vmem [shape: f32[32,8], index: 1, kind: input, shape index: {}]   ;;  %s341_s2 = inlined_call_operand.vmem [shape: f32[1,8], index: 2, kind: input, shape index: {}]   ;;  %s342_s3 = inlined_call_operand.vmem [shape: f32[8,2], index: 3, kind: input, shape index: {}]   ;;  %s343_s4 = inlined_call_operand.vmem [shape: f32[1,2], index: 4, kind: input, shape index: {}]   ;;  %s344_s5 = inlined_call_operand.hbm [shape: f32[2,2], index: 5, kind: output, shape index: {}]  }
   0x1   :  { %v22_v0 = vld [vmem:[%s340_s1] sm:$0xff]  ;;  %v23_v1 = vld [vmem:[%s340_s1 + $0x8] sm:$0xff]  ;;  %v24_v2 = vld [vmem:[%s340_s1 + $0x10] sm:$0xff]  ;;  %235 = vmatprep.subr.bf16.mxu0 %v269_v3  ;;  %227 = vmatprep.mubr.msk.f32.mxu0 %vm270_vm0, %v271_v6 }
   0x2   :  { %v236_v4 = vpack.c.bf16 %v23_v1, %v22_v0  ;;  %v25_v5 = vld [vmem:[%s340_s1 + $0x18] sm:$0xff]  ;;  %230 = vmatprep.subr.mxu1 %v271_v6  ;;  %232 = vmatprep.mubr.msk.f32.mxu1 %vm270_vm0, %v271_v6 }
   0x3   :  { %10 = vsyncpa [#allocation3], 0  ;;  %v239_v7 = vpack.c.bf16 %v25_v5, %v24_v2  ;;  %v21_v8 = vld [vmem:[%s339_s0] sm:$0x3]  ;;  %vm33_vm1 = vcmask 261120   ;;  %vm116_vm2 = vcmask 64512  }
   0x4   :  { %237 = vmatpush3.bf16.msra.mxu0 %v236_v4  ;;  %v108_v9 = vld [vmem:[%s342_s3] sm:$0xff]  ;;  %s272_s0 = smov [#allocation2]   ;;  %vm192_vm3 = vcmask 9216  }
   0x5   :  { %238 = vmatprep.subr.bf16.mxu0 %v269_v3  ;;  %231 = vmatpush3.msra.mxu1 %v108_v9  ;;  %v208_v10 = vld [vmem:[%s341_s2] ss:$0 sm:$0xff]  ;;  %s200_s3 = sshll.u32 %s272_s0, 4  ;;  %s201_s3 = int_to_ptr.vmem [resolvable:$true] %s200_s3 }
   0x6   :  { %v210_v15 = vld [vmem:[%s343_s4] ss:$0 sm:$0xff]  ;;  %s245_s2 = scalar_lea.vmem %s201_s3, 32  ;;  %p250_p1 = scmp.lt.s32.totalorder %s201_s3, %s201_s3 }
   0x7   :  { %p246_p0 = scmp.ne.s32.totalorder %s201_s3, %s245_s2  ;;  %p251_p2 = scmp.lt.s32.totalorder %s245_s2, %s245_s2 }
   0x8   :  { %240 = vmatpush3.bf16.msra.mxu0 %v239_v7 }
   0x9   :  { %p252_p3 = por %p251_p2, %p250_p1 }
   0xb   :  { %228 = vmatmul.mubr.msk.f32.vlgmr.msra.gmra.mrb[0].mxu0 %vm33_vm1, %v21_v8  ;;  %p253_p4 = pnand %p252_p3, %p246_p0 }
  0xde   :  { %v103_v11 = vpop.f32.mrb[0].mxu0 }
  0xdf   :  { %v104_v12 = vadd.f32 %v208_v10, %v103_v11  ;;  %v229_v13 = vpop.f32.mrb[1].mxu0 }
  0xe1   :  { %v107_v14 = vmax.f32 %v104_v12, 0.0 }
  0xe3   :  { %233 = vmatmul.mubr.msk.f32.vlgmr.msra.gmra.mrb[0].mxu1 %vm116_vm2, %v107_v14 }
 0x1b6   :  { %v186_v16 = vpop.f32.mrb[0].mxu1 }
 0x1b7   :  { %v187_v17 = vadd.f32 %v210_v15, %v186_v16  ;;  %v234_v18 = vpop.f32.mrb[1].mxu1 }
 0x1b9   :  { %v190_v19 = vmax.f32 %v187_v17, 0.0 }
 0x1bb   :  { %v191_v20 = vadd.f32 0.01, %v190_v19 }
 0x1bd   :  { %193 = vst.msk [vmem:[#allocation2] sm:$0x3] %vm192_vm3, %v191_v20 }
 0x1be   :  { %256 = shalt.err (!%p253_p4)
}
 0x1bf   :  { %s257_s4 = scalar_lea.hbm %s344_s5, 32 }
 0x1c0   :  { %p258_p5 = scmp.ne.s32.totalorder %s344_s5, %s257_s4  ;;  %p261_p6 = scmp.lt.u32.totalorder %s257_s4, %s344_s5 }
 0x1c2   :  { %p263_p7 = pnand %p261_p6, %p258_p5 }
 0x1c4   :  { %266 = shalt.err (!%p263_p7)
}
 0x1c5   :  { %203 = dma.vmem_to_hbm [thread:$0]  %s201_s3, 32, %s344_s5, [#allocation3]  }
 0x1c6   :  { %267 = dma.done.wait [#allocation3], 32  }
 0x1c7   :  { %268 = vsyncadd [#allocation3], 4294967264 }
 0x1c8   :  { %207 = vsyncpa [#allocation3], 1 }

</bundles_post_ra>
